<compile_context>
chip_gen: v7x
topology: tpu7x:2x2x1
jax: 0.10.0
libtpu: 0.0.40
codegen_flags: <defaults>
</compile_context>

<pallas_src>
import jax
import jax.numpy as jnp
from jax.experimental import pallas as pl
from jax.experimental.pallas import tpu as pltpu

_PAD = 128        # lane-padded width for hidden / packed weight columns
_TB_MAX = 4096    # max rows per batch tile (VMEM use ~6-7 MiB at this size)


def _round_up(n, m):
    return ((n + m - 1) // m) * m


def _make_kernel(input_dim, in_p, output_dim):
    """Kernel over one batch tile. Packed slab layout (rows):
       [0:8)            bias block: row 0 = b1, row 1 = b2, row 2 = b3
       [8 : 8+in_p)     w1 (zero-padded to in_p x 128)
       [8+in_p : +128)  w2 (128 x 128, zero-padded)
       [.. : +128)      w3 (128 x 128, zero-padded)
    """
    w2_off = 8 + in_p
    w3_off = w2_off + _PAD

    def kernel(x_ref, p_ref, o_ref):
        x = x_ref[...]                               # (TB, input_dim) f32
        bias_blk = p_ref[0:8, :]                     # aligned (8,128) load
        b1 = bias_blk[0:1, :]
        b2 = bias_blk[1:2, :]
        b3 = bias_blk[2:3, :]

        if input_dim == 1:
            # K=1 matmul is a pure outer product: do it on the VPU, not the MXU.
            w1_blk = p_ref[8:16, :]                  # aligned (8,128) load
            h1 = x * w1_blk[0:1, :] + b1             # (TB,1)*(1,128) -> (TB,128)
        else:
            h1 = jnp.dot(x, p_ref[8:8 + input_dim, :],
                         preferred_element_type=jnp.float32) + b1
        h1 = jnp.maximum(h1, 0.0)

        h2 = jnp.dot(h1, p_ref[w2_off:w3_off, :],
                     preferred_element_type=jnp.float32) + b2
        h2 = jnp.maximum(h2, 0.0)

        out = jnp.dot(h2, p_ref[w3_off:w3_off + _PAD, :],
                      preferred_element_type=jnp.float32) + b3
        # Narrow, un-padded writeback: only the real output_dim lanes hit HBM.
        o_ref[...] = out[:, :output_dim].astype(o_ref.dtype)

    return kernel


def pack_params(params):
    """Pack (pre-transposed) weights + biases into one lane-dense f32 slab."""
    w1, b1 = params["w1"], params["b1"]
    w2, b2 = params["w2"], params["b2"]
    w3, b3 = params["w3"], params["b3"]
    input_dim, hidden_dim = w1.shape
    output_dim = w3.shape[1]
    assert hidden_dim <= _PAD and output_dim <= _PAD

    in_p = max(8, _round_up(input_dim, 8))
    rows = 8 + in_p + 2 * _PAD
    slab = jnp.zeros((rows, _PAD), jnp.float32)
    slab = slab.at[0, :hidden_dim].set(b1)
    slab = slab.at[1, :hidden_dim].set(b2)
    slab = slab.at[2, :output_dim].set(b3)
    slab = slab.at[8:8 + input_dim, :hidden_dim].set(w1)
    slab = slab.at[8 + in_p:8 + in_p + hidden_dim, :hidden_dim].set(w2)
    slab = slab.at[8 + in_p + _PAD:8 + in_p + _PAD + hidden_dim, :output_dim].set(w3)
    return slab


def local_embedding_network(x, packed, *, input_dim, hidden_dim, output_dim):
    """x: (B, input_dim) f32.  packed: slab from pack_params()."""
    assert hidden_dim <= _PAD and output_dim <= _PAD
    B = x.shape[0]
    assert x.shape[1] == input_dim
    in_p = max(8, _round_up(input_dim, 8))
    assert packed.shape == (8 + in_p + 2 * _PAD, _PAD)

    x_in = x.astype(jnp.float32)

    # Batch tiling:
    #  * tiny batches (B <= 8): a single block equal to the full array dim;
    #  * otherwise split into >= 2 tiles (v7x has 2 TCs to feed via the
    #    "parallel" axis), capped at _TB_MAX rows per tile.
    # Non-divisible tails are handled by Pallas edge-block masking.
    if B <= 8:
        TB = max(B, 1)
    else:
        TB = min(_TB_MAX, _round_up(-(-B // 2), 8))
    num_tiles = -(-B // TB)

    out = pl.pallas_call(
        _make_kernel(input_dim, in_p, output_dim),
        out_shape=jax.ShapeDtypeStruct((B, output_dim), jnp.float32),
        grid=(num_tiles,),
        in_specs=[
            pl.BlockSpec((TB, input_dim), lambda i: (i, 0)),   # streamed x tiles
            pl.BlockSpec(packed.shape, lambda i: (0, 0)),      # resident params
        ],
        out_specs=pl.BlockSpec((TB, output_dim), lambda i: (i, 0)),
        compiler_params=pltpu.CompilerParams(
            dimension_semantics=("parallel",),
            vmem_limit_bytes=32 * 1024 * 1024),
    )(x_in, packed)

    return out


def init_params(key, input_dim=1, hidden_dim=32, output_dim=16):
    """PyTorch-nn.Linear-style init; weights stored pre-transposed as (in, out)."""
    ks = jax.random.split(key, 6)

    def linear(kw, kb, fan_in, fan_out):
        bound = 1.0 / float(fan_in) ** 0.5
        w = jax.random.uniform(kw, (fan_in, fan_out), jnp.float32, -bound, bound)
        b = jax.random.uniform(kb, (fan_out,), jnp.float32, -bound, bound)
        return w, b

    w1, b1 = linear(ks[0], ks[1], input_dim, hidden_dim)
    w2, b2 = linear(ks[2], ks[3], hidden_dim, hidden_dim)
    w3, b3 = linear(ks[4], ks[5], hidden_dim, output_dim)
    return {"w1": w1, "b1": b1, "w2": w2, "b2": b2, "w3": w3, "b3": b3}


def reference(x, p):
    h1 = jax.nn.relu(x @ p["w1"] + p["b1"])
    h2 = jax.nn.relu(h1 @ p["w2"] + p["b2"])
    return h2 @ p["w3"] + p["b3"]


if __name__ == "__main__":
    key = jax.random.PRNGKey(0)
    k_x, k_p, k_x2 = jax.random.split(key, 3)

    batch, input_dim, hidden_dim, output_dim = 8, 1, 32, 16
    params = init_params(k_p, input_dim, hidden_dim, output_dim)
    packed = pack_params(params)

    # Small-batch check (single tile, block == full array dims).
    x = jax.random.normal(k_x, (batch, input_dim), jnp.float32)
    out = local_embedding_network(
        x, packed, input_dim=input_dim, hidden_dim=hidden_dim, output_dim=output_dim)
    out = jax.block_until_ready(out)
    ref = reference(x, params)
    assert out.shape == (batch, output_dim)
    assert jnp.allclose(out, ref, atol=1e-5, rtol=1e-5), "mismatch vs reference (B=8)"

    # Multi-tile + non-divisible-tail check (exercises edge-block masking and
    # the 2-way tile split used to feed both v7x TensorCores).
    B2 = 1100
    x2 = jax.random.normal(k_x2, (B2, input_dim), jnp.float32)
    out2 = local_embedding_network(
        x2, packed, input_dim=input_dim, hidden_dim=hidden_dim, output_dim=output_dim)
    out2 = jax.block_until_ready(out2)
    ref2 = reference(x2, params)
    assert out2.shape == (B2, output_dim)
    assert jnp.allclose(out2, ref2, atol=1e-5, rtol=1e-5), "mismatch vs reference (B=1100)"

    print("KERNEL_OK")
</pallas_src>

<mosaic_0001>
module attributes {stable_mosaic.version = 11 : i64} {
  func.func @kernel(%arg0: i32, %arg1: memref<8x1xf32, #tpu.memory_space<vmem>>, %arg2: memref<272x128xf32, #tpu.memory_space<vmem>>, %arg3: memref<8x16xf32, #tpu.memory_space<vmem>>) attributes {dimension_semantics = [#tpu.dimension_semantics<parallel>], iteration_bounds = array<i64: 1>, scalar_prefetch = 0 : i64, scratch_operands = 0 : i64, tpu.core_type = #tpu.core_type<tc>, window_params = [{transform_indices = @transform_0, window_bounds = array<i64: 8, 1>}, {pipeline_mode = #tpu.pipeline_mode<synchronous>, transform_indices = @transform_1, window_bounds = array<i64: 272, 128>}, {transform_indices = @transform_2, window_bounds = array<i64: 8, 16>}]} {
    %c0 = arith.constant 0 : index
    %c0_0 = arith.constant 0 : index
    %0 = vector.load %arg1[%c0, %c0_0] : memref<8x1xf32, #tpu.memory_space<vmem>>, vector<8x1xf32>
    %c0_1 = arith.constant 0 : index
    %c0_2 = arith.constant 0 : index
    %1 = vector.load %arg2[%c0_1, %c0_2] : memref<272x128xf32, #tpu.memory_space<vmem>>, vector<8x128xf32>
    %2 = vector.extract_strided_slice %1 {offsets = [0, 0], sizes = [1, 128], strides = [1, 1]} : vector<8x128xf32> to vector<1x128xf32>
    %3 = vector.extract_strided_slice %1 {offsets = [1, 0], sizes = [1, 128], strides = [1, 1]} : vector<8x128xf32> to vector<1x128xf32>
    %4 = vector.extract_strided_slice %1 {offsets = [2, 0], sizes = [1, 128], strides = [1, 1]} : vector<8x128xf32> to vector<1x128xf32>
    %c8 = arith.constant 8 : index
    %c0_3 = arith.constant 0 : index
    %5 = vector.load %arg2[%c8, %c0_3] : memref<272x128xf32, #tpu.memory_space<vmem>>, vector<8x128xf32>
    %6 = vector.extract_strided_slice %5 {offsets = [0, 0], sizes = [1, 128], strides = [1, 1]} : vector<8x128xf32> to vector<1x128xf32>
    %7 = vector.broadcast %0 : vector<8x1xf32> to vector<8x128xf32>
    %8 = vector.broadcast %6 : vector<1x128xf32> to vector<8x128xf32>
    %9 = arith.mulf %7, %8 : vector<8x128xf32>
    %10 = vector.broadcast %2 : vector<1x128xf32> to vector<8x128xf32>
    %11 = arith.addf %9, %10 : vector<8x128xf32>
    %cst = arith.constant 0.000000e+00 : f32
    %12 = vector.broadcast %cst : f32 to vector<8x128xf32>
    %13 = arith.maximumf %11, %12 : vector<8x128xf32>
    %c16 = arith.constant 16 : index
    %c0_4 = arith.constant 0 : index
    %14 = vector.load %arg2[%c16, %c0_4] : memref<272x128xf32, #tpu.memory_space<vmem>>, vector<128x128xf32>
    %cst_5 = arith.constant dense<0.000000e+00> : vector<8x128xf32>
    %15 = tpu.matmul %13, %14, %cst_5 {dimension_numbers = #tpu.dot_dimension_numbers<[1], [0], [0], [1], [0, 0, 1, 1], [], []>} : vector<8x128xf32>, vector<128x128xf32>, vector<8x128xf32> -> vector<8x128xf32>
    %16 = vector.broadcast %3 : vector<1x128xf32> to vector<8x128xf32>
    %17 = arith.addf %15, %16 : vector<8x128xf32>
    %cst_6 = arith.constant 0.000000e+00 : f32
    %18 = vector.broadcast %cst_6 : f32 to vector<8x128xf32>
    %19 = arith.maximumf %17, %18 : vector<8x128xf32>
    %c144 = arith.constant 144 : index
    %c0_7 = arith.constant 0 : index
    %20 = vector.load %arg2[%c144, %c0_7] : memref<272x128xf32, #tpu.memory_space<vmem>>, vector<128x128xf32>
    %cst_8 = arith.constant dense<0.000000e+00> : vector<8x128xf32>
    %21 = tpu.matmul %19, %20, %cst_8 {dimension_numbers = #tpu.dot_dimension_numbers<[1], [0], [0], [1], [0, 0, 1, 1], [], []>} : vector<8x128xf32>, vector<128x128xf32>, vector<8x128xf32> -> vector<8x128xf32>
    %22 = vector.broadcast %4 : vector<1x128xf32> to vector<8x128xf32>
    %23 = arith.addf %21, %22 : vector<8x128xf32>
    %24 = vector.extract_strided_slice %23 {offsets = [0, 0], sizes = [8, 16], strides = [1, 1]} : vector<8x128xf32> to vector<8x16xf32>
    %c0_9 = arith.constant 0 : index
    %c0_10 = arith.constant 0 : index
    %25 = vector.load %arg3[%c0_9, %c0_10] : memref<8x16xf32, #tpu.memory_space<vmem>>, vector<8x16xf32>
    tpu.vector_store %arg3[%c0_9, %c0_10], %24 {strides = array<i32>} : memref<8x16xf32, #tpu.memory_space<vmem>>, vector<8x16xf32>,
    return
  }
  func.func @transform_0(%arg0: i32) -> (i32, i32) {
    %c0_i32 = arith.constant 0 : i32
    %c0_i32_0 = arith.constant 0 : i32
    return %arg0, %c0_i32 : i32, i32
  }
  func.func @transform_1(%arg0: i32) -> (i32, i32) {
    %c0_i32 = arith.constant 0 : i32
    %c0_i32_0 = arith.constant 0 : i32
    %c0_i32_1 = arith.constant 0 : i32
    return %c0_i32, %c0_i32_0 : i32, i32
  }
  func.func @transform_2(%arg0: i32) -> (i32, i32) {
    %c0_i32 = arith.constant 0 : i32
    %c0_i32_0 = arith.constant 0 : i32
    return %arg0, %c0_i32 : i32, i32
  }
}

</mosaic_0001>

<bundles_post_ra>
// kernel: tpu_custom_call.1
= control target key start
LH: loop header
LB: loop body
LE: loop exit
PB: predicated region body
PF: predicated region fallthrough
CT: control target
= control target key end

     0   :  { %7 = vsyncpa [#allocation3], 0  ;;  %s518_s0 = inlined_call_operand.vmem [shape: f32[8,1], index: 0, kind: input, shape index: {}]   ;;  %s519_s1 = inlined_call_operand.hbm [shape: f32[272,128], index: 1, kind: input, shape index: {}]   ;;  %s520_s2 = inlined_call_operand.hbm [shape: f32[8,16], index: 2, kind: output, shape index: {}]  }
   0x1   :  { %8 = vsyncpa [#allocation4], 0  ;;  %s452_s9 = smov [#allocation2]   ;;  %s404_s13 = scalar_lea.hbm %s519_s1, 4352 }
   0x2   :  { %s16_s10 = sshll.u32 %s452_s9, 4  ;;  %p405_p0 = scmp.ne.s32.totalorder %s519_s1, %s404_s13  ;;  %s17_s10 = int_to_ptr.vmem [resolvable:$true] %s16_s10 }
   0x3   :  { %p408_p1 = scmp.lt.u32.totalorder %s404_s13, %s519_s1 }
   0x5   :  { %p410_p2 = pnand %p408_p1, %p405_p0 }
   0x7   :  { %413 = shalt.err (!%p410_p2)
}
   0x8   :  { %s414_s18 = scalar_lea.vmem %s17_s10, 4352  ;;  %p419_p4 = scmp.lt.s32.totalorder %s17_s10, %s17_s10 }
   0x9   :  { %p415_p3 = scmp.ne.s32.totalorder %s17_s10, %s414_s18  ;;  %p420_p5 = scmp.lt.s32.totalorder %s414_s18, %s414_s18 }
   0xb   :  { %p421_p6 = por %p420_p5, %p419_p4 }
   0xd   :  { %p422_p7 = pnand %p421_p6, %p415_p3 }
   0xf   :  { %425 = shalt.err (!%p422_p7)
}
  0x10   :  { %s453_s19 = smov 128   ;;  %s454_s20 = smov 8  }
  0x11   :  { %22 = dma.hbm_to_vmem [thread:$0]  %s519_s1, 4352, %s17_s10, [#allocation3], %s453_s19, %s453_s19, %s454_s20  }
  0x12   :  { %448 = dma.done.wait [#allocation3], 4352  }
  0x13   :  { %449 = vsyncadd [#allocation3], 4294962944  ;;  %v455_v0 = vmov 0   ;;  %v456_v1 = vmov 0.0|0.0   ;;  %v26_v2 = vld [vmem:[%s518_s0] sm:$0xff]  ;;  %v45_v3 = vld [vmem:[#allocation2 + $0x10] sm:$0xff]  ;;  %v34_v49 = vlaneseq }
  0x14   :  { %403 = vset.pattern.permute.xlu0 %v455_v0  ;;  %347 = vmatprep.subr.bf16.mxu0 %v456_v1  ;;  %v46_v4 = vld [vmem:[#allocation2 + $0x18] sm:$0xff]  ;;  %v47_v6 = vld [vmem:[#allocation2 + $0x20] sm:$0xff]  ;;  %v48_v7 = vld [vmem:[#allocation2 + $0x28] sm:$0xff]  ;;  %vm457_vm0 = vmmov 0   ;;  %v458_v11 = vmov 0.0   ;;  %s459_s0 = smov [#allocation5]  }
  0x15   :  { %371 = vmatprep.subr.bf16.mxu1 %v456_v1  ;;  %31 = vperm.xlu0 %403, %v26_v2   ;;  %v348_v5 = vpack.c.bf16 %v46_v4, %v45_v3  ;;  %v351_v8 = vpack.c.bf16 %v48_v7, %v47_v6  ;;  %v49_v9 = vld [vmem:[#allocation2 + $0x30] sm:$0xff]  ;;  %v50_v10 = vld [vmem:[#allocation2 + $0x38] sm:$0xff]  ;;  %v138_v15 = vld [vmem:[#allocation2 + $0xa0] sm:$0xff]  ;;  %v35_v50 = vshrl.u32 %v34_v49, 7  ;;  %s234_s1 = sshll.u32 %s459_s0, 4  ;;  %vm226_vm1 = vcmask 130048   ;;  %s235_s1 = int_to_ptr.vmem [resolvable:$true] %s234_s1 }
  0x16   :  { %309 = vmatprep.mubr.msk.f32.mxu0 %vm457_vm0, %v458_v11  ;;  %344 = vmatprep.mubr.msk.f32.mxu1 %vm457_vm0, %v458_v11  ;;  %v354_v12 = vpack.c.bf16 %v50_v10, %v49_v9  ;;  %v136_v13 = vld [vmem:[#allocation2 + $0x90] sm:$0xff]  ;;  %v137_v14 = vld [vmem:[#allocation2 + $0x98] sm:$0xff]  ;;  %v51_v16 = vld [vmem:[#allocation2 + $0x40] sm:$0xff]  ;;  %s426_s25 = scalar_lea.vmem %s235_s1, 128  ;;  %p431_p9 = scmp.lt.s32.totalorder %s235_s1, %s235_s1 }
  0x17   :  { %349 = vmatpush3.bf16.msra.mxu0 %v348_v5  ;;  %v52_v17 = vld [vmem:[#allocation2 + $0x48] sm:$0xff]  ;;  %v372_v18 = vpack.c.bf16 %v137_v14, %v136_v13  ;;  %v140_v22 = vld [vmem:[#allocation2 + $0xb0] sm:$0xff]  ;;  %v141_v23 = vld [vmem:[#allocation2 + $0xb8] sm:$0xff]  ;;  %v36_v51 = vsub.s32 0, %v35_v50  ;;  %v63_v63 = vsub.s32 1, %v35_v50  ;;  %v154_v5 = vsub.s32 2, %v35_v50  ;;  %p427_p8 = scmp.ne.s32.totalorder %s235_s1, %s426_s25  ;;  %p432_p10 = scmp.lt.s32.totalorder %s426_s25, %s426_s25 }
  0x18   :  { %350 = vmatprep.subr.bf16.mxu0 %v456_v1  ;;  %v139_v19 = vld [vmem:[#allocation2 + $0xa8] sm:$0xff]  ;;  %v357_v21 = vpack.c.bf16 %v52_v17, %v51_v16  ;;  %v53_v24 = vld [vmem:[#allocation2 + $0x50] sm:$0xff]  ;;  %v54_v25 = vld [vmem:[#allocation2 + $0x58] sm:$0xff]  ;;  %v378_v26 = vpack.c.bf16 %v141_v23, %v140_v22 }
  0x19   :  { %373 = vmatpush3.bf16.msra.mxu1 %v372_v18  ;;  %v375_v20 = vpack.c.bf16 %v139_v19, %v138_v15  ;;  %v360_v27 = vpack.c.bf16 %v54_v25, %v53_v24  ;;  %v142_v28 = vld [vmem:[#allocation2 + $0xc0] sm:$0xff]  ;;  %v143_v29 = vld [vmem:[#allocation2 + $0xc8] sm:$0xff]  ;;  %v144_v34 = vld [vmem:[#allocation2 + $0xd0] sm:$0xff]  ;;  %p433_p11 = por %p432_p10, %p431_p9 }
  0x1a   :  { %374 = vmatprep.subr.bf16.mxu1 %v456_v1  ;;  %v55_v30 = vld [vmem:[#allocation2 + $0x60] sm:$0xff]  ;;  %v56_v31 = vld [vmem:[#allocation2 + $0x68] sm:$0xff]  ;;  %v381_v32 = vpack.c.bf16 %v143_v29, %v142_v28  ;;  %v145_v35 = vld [vmem:[#allocation2 + $0xd8] sm:$0xff] }
  0x1b   :  { %352 = vmatpush3.bf16.msra.mxu0 %v351_v8  ;;  %v363_v33 = vpack.c.bf16 %v56_v31, %v55_v30  ;;  %v57_v36 = vld [vmem:[#allocation2 + $0x70] sm:$0xff]  ;;  %v58_v37 = vld [vmem:[#allocation2 + $0x78] sm:$0xff]  ;;  %v384_v38 = vpack.c.bf16 %v145_v35, %v144_v34  ;;  %v146_v40 = vld [vmem:[#allocation2 + $0xe0] sm:$0xff]  ;;  %p434_p12 = pnand %p433_p11, %p427_p8 }
  0x1c   :  { %353 = vmatprep.subr.bf16.mxu0 %v456_v1  ;;  %v366_v39 = vpack.c.bf16 %v58_v37, %v57_v36  ;;  %v147_v41 = vld [vmem:[#allocation2 + $0xe8] sm:$0xff]  ;;  %v59_v42 = vld [vmem:[#allocation2 + $0x80] sm:$0xff]  ;;  %v148_v46 = vld [vmem:[#allocation2 + $0xf0] sm:$0xff] }
  0x1d   :  { %376 = vmatpush3.bf16.msra.mxu1 %v375_v20  ;;  %v60_v43 = vld [vmem:[#allocation2 + $0x88] sm:$0xff]  ;;  %v387_v44 = vpack.c.bf16 %v147_v41, %v146_v40  ;;  %v149_v47 = vld [vmem:[#allocation2 + $0xf8] sm:$0xff]  ;;  %v27_v53 = vld [vmem:[#allocation2] sm:$0xff] }
  0x1e   :  { %377 = vmatprep.subr.bf16.mxu1 %v456_v1  ;;  %v369_v45 = vpack.c.bf16 %v60_v43, %v59_v42  ;;  %v390_v48 = vpack.c.bf16 %v149_v47, %v148_v46  ;;  %v28_v52 = vld [vmem:[#allocation2 + $0x8] sm:$0xff]  ;;  %v42_v55 = vrot.slane %v27_v53, %v36_v51  ;;  %v150_v60 = vld [vmem:[#allocation2 + $0x100] sm:$0xff]  ;;  %v64_v0 = vrot.slane %v27_v53, %v63_v63 }
  0x1f   :  { %355 = vmatpush3.bf16.msra.mxu0 %v354_v12  ;;  %v37_v54 = vrot.slane %v28_v52, %v36_v51  ;;  %v151_v61 = vld [vmem:[#allocation2 + $0x108] sm:$0xff]  ;;  %v155_v6 = vrot.slane %v27_v53, %v154_v5 }
  0x20   :  { %356 = vmatprep.subr.bf16.mxu0 %v456_v1  ;;  %v393_v62 = vpack.c.bf16 %v151_v61, %v150_v60 }
  0x21   :  { %379 = vmatpush3.bf16.msra.mxu1 %v378_v26 }
  0x22   :  { %380 = vmatprep.subr.bf16.mxu1 %v456_v1 }
  0x23   :  { %358 = vmatpush3.bf16.msra.mxu0 %v357_v21 }
  0x24   :  { %359 = vmatprep.subr.bf16.mxu0 %v456_v1 }
  0x25   :  { %382 = vmatpush3.bf16.msra.mxu1 %v381_v32 }
  0x26   :  { %383 = vmatprep.subr.bf16.mxu1 %v456_v1 }
  0x27   :  { %361 = vmatpush3.bf16.msra.mxu0 %v360_v27 }
  0x28   :  { %362 = vmatprep.subr.bf16.mxu0 %v456_v1 }
  0x29   :  { %385 = vmatpush3.bf16.msra.mxu1 %v384_v38 }
  0x2a   :  { %386 = vmatprep.subr.bf16.mxu1 %v456_v1 }
  0x2b   :  { %364 = vmatpush3.bf16.msra.mxu0 %v363_v33 }
  0x2c   :  { %365 = vmatprep.subr.bf16.mxu0 %v456_v1 }
  0x2d   :  { %388 = vmatpush3.bf16.msra.mxu1 %v387_v44 }
  0x2e   :  { %389 = vmatprep.subr.bf16.mxu1 %v456_v1 }
  0x2f   :  { %367 = vmatpush3.bf16.msra.mxu0 %v366_v39 }
  0x30   :  { %368 = vmatprep.subr.bf16.mxu0 %v456_v1 }
  0x31   :  { %391 = vmatpush3.bf16.msra.mxu1 %v390_v48 }
  0x32   :  { %392 = vmatprep.subr.bf16.mxu1 %v456_v1 }
  0x33   :  { %370 = vmatpush3.bf16.msra.mxu0 %v369_v45 }
  0x35   :  { %394 = vmatpush3.bf16.msra.mxu1 %v393_v62 }
  0x94   :  { %v32_v56 = vpop.permute.xlu0 %31 }
  0x95   :  { %v38_v57 = vmul.f32 %v37_v54, %v32_v56 }
  0x97   :  { %v43_v58 = vadd.f32 %v42_v55, %v38_v57 }
  0x99   :  { %v44_v59 = vmax.f32 %v43_v58, 0.0 }
  0x9b   :  { %310 = vmatmul.mubr.f32.vlgmr.msra.gmra.mrb[0].mxu0 %v44_v59 }
 0x16e   :  { %v131_v2 = vpop.f32.mrb[0].mxu0 }
 0x16f   :  { %v132_v1 = vadd.f32 %v131_v2, %v64_v0  ;;  %v311_v3 = vpop.f32.mrb[1].mxu0 }
 0x171   :  { %v135_v4 = vmax.f32 %v132_v1, 0.0 }
 0x173   :  { %345 = vmatmul.mubr.f32.vlgmr.msra.gmra.mrb[0].mxu1 %v135_v4 }
 0x246   :  { %v222_v7 = vpop.f32.mrb[0].mxu1 }
 0x247   :  { %v223_v8 = vadd.f32 %v222_v7, %v155_v6  ;;  %v346_v9 = vpop.f32.mrb[1].mxu1 }
 0x249   :  { %227 = vst.msk [vmem:[#allocation5] sm:$0xff] %vm226_vm1, %v223_v8 }
 0x24a   :  { %437 = shalt.err (!%p434_p12)
}
 0x24b   :  { %s438_s28 = scalar_lea.hbm %s520_s2, 128 }
 0x24c   :  { %p439_p13 = scmp.ne.s32.totalorder %s520_s2, %s438_s28  ;;  %p442_p0 = scmp.lt.u32.totalorder %s438_s28, %s520_s2 }
 0x24e   :  { %p444_p1 = pnand %p442_p0, %p439_p13 }
 0x250   :  { %447 = shalt.err (!%p444_p1)
}
 0x251   :  { %237 = dma.vmem_to_hbm [thread:$0]  %s235_s1, 128, %s520_s2, [#allocation4]  }
 0x252   :  { %450 = dma.done.wait [#allocation4], 128  }
 0x253   :  { %451 = vsyncadd [#allocation4], 4294967168 }
 0x254   :  { %241 = vsyncpa [#allocation3], 1 }
 0x255   :  { %242 = vsyncpa [#allocation4], 1 }

</bundles_post_ra>
